<compile_context>
chip_gen: v7x
topology: tpu7x:2x2x1
jax: 0.10.0
libtpu: 0.0.40
codegen_flags: <defaults>
</compile_context>

<pallas_src>
import jax
import jax.numpy as jnp
from jax.experimental import pallas as pl
from jax.experimental.pallas import tpu as pltpu


def _rope_kernel(x_ref, cos_ref, sin_ref, o_ref):
    # x_ref / o_ref: (TS, D)  (batch dim squeezed);  cos_ref / sin_ref: (TS, D)
    x = x_ref[...]
    D = x.shape[-1]
    half = D // 2
    if D % 128 == 0:
        # Lane-dense fast path: XLU rotation is essentially free next to the VPU muls.
        rot = pltpu.roll(x, shift=half, axis=-1)
    else:
        # Small / non-lane-aligned D: plain swap of halves (sign already in the table).
        rot = jnp.concatenate([x[..., half:], x[..., :half]], axis=-1)
    o_ref[...] = x * cos_ref[...] + rot * sin_ref[...]


def _choose_seq_tile(S: int, D: int, itemsize: int, budget_bytes: int = 16 << 20) -> int:
    """Largest sublane-aligned divisor of S whose ~8 resident (TS, D) tiles
    (double-buffered x/out + cos/sin) fit the VMEM budget."""
    sublane = max(8, 32 // itemsize)          # 8 for f32, 16 for bf16, 32 for int8
    row_bytes = D * itemsize
    cap = max(sublane, budget_bytes // (8 * row_bytes))
    if S <= cap:
        return S
    ts = (cap // sublane) * sublane
    while ts >= sublane:
        if S % ts == 0:
            return ts
        ts -= sublane
    return S  # no aligned divisor found; fall back to the full sequence


def rotary_positional_embedding(x: jax.Array) -> jax.Array:
    """Apply RoPE to x of shape (B, S, D). D must be even."""
    B, S, D = x.shape
    assert D % 2 == 0, "dim must be even for RoPE"
    # NOTE: for peak throughput D should be a multiple of 128 (lane-dense stores +
    # XLU roll path); smaller D is still correct but uses masked partial stores.

    # Table setup (matches torch __init__ + forward precompute).
    inv_freq = 1.0 / (10000.0 ** (jnp.arange(0, D, 2, dtype=jnp.float32) / D))  # (D/2,)
    t = jnp.arange(S, dtype=jnp.float32)                                         # (S,)
    freqs = jnp.einsum("i,j->ij", t, inv_freq)                                   # (S, D/2)
    cos_half = jnp.cos(freqs)
    sin_half = jnp.sin(freqs)
    cos_emb = jnp.concatenate([cos_half, cos_half], axis=-1).astype(x.dtype)     # (S, D)
    # rotate_half(x) = cat(-x2, x1); we instead rotate x to cat(x2, x1) and fold the
    # sign into the sin table: sin_signed = cat(-sin, sin).
    sin_signed = jnp.concatenate([-sin_half, sin_half], axis=-1).astype(x.dtype)  # (S, D)
    # TODO(synk): for strict bit-parity with the PyTorch module on bf16 inputs, keep the
    # tables in fp32 and cast only the product (costs 2x table bandwidth).

    itemsize = jnp.dtype(x.dtype).itemsize
    TS = _choose_seq_tile(S, D, itemsize)
    num_s_tiles = pl.cdiv(S, TS)

    cost = pl.CostEstimate(
        flops=3 * B * S * D,
        transcendentals=0,
        bytes_accessed=2 * B * S * D * itemsize + 2 * S * D * itemsize,
    )

    # S-tile axis outermost, batch innermost -> cos/sin tiles stay resident across B.
    grid = (num_s_tiles, B)

    return pl.pallas_call(
        _rope_kernel,
        out_shape=jax.ShapeDtypeStruct((B, S, D), x.dtype),
        grid_spec=pltpu.PrefetchScalarGridSpec(
            num_scalar_prefetch=0,
            grid=grid,
            in_specs=[
                pl.BlockSpec((pl.Squeezed(), TS, D), lambda s, b: (b, s, 0)),  # x
                pl.BlockSpec((TS, D), lambda s, b: (s, 0)),                    # cos
                pl.BlockSpec((TS, D), lambda s, b: (s, 0)),                    # sin (signed)
            ],
            out_specs=pl.BlockSpec((pl.Squeezed(), TS, D), lambda s, b: (b, s, 0)),
        ),
        compiler_params=pltpu.CompilerParams(
            dimension_semantics=("parallel", "parallel"),
            vmem_limit_bytes=48 * 1024 * 1024,
        ),
        cost_estimate=cost,
    )(x, cos_emb, sin_signed)


def rope_reference(x: jax.Array) -> jax.Array:
    """Pure-JAX reference mirroring the PyTorch forward."""
    B, S, D = x.shape
    inv_freq = 1.0 / (10000.0 ** (jnp.arange(0, D, 2, dtype=jnp.float32) / D))
    t = jnp.arange(S, dtype=jnp.float32)
    freqs = jnp.einsum("i,j->ij", t, inv_freq)
    emb = jnp.concatenate([freqs, freqs], axis=-1)
    cos_emb = jnp.cos(emb)[None]
    sin_emb = jnp.sin(emb)[None]
    x1 = x[..., : D // 2]
    x2 = x[..., D // 2:]
    rot = jnp.concatenate([-x2, x1], axis=-1)
    return x * cos_emb + rot * sin_emb


if __name__ == "__main__":
    B, S, D = 2, 8, 32
    key = jax.random.PRNGKey(0)
    x = jax.random.normal(key, (B, S, D), dtype=jnp.float32)

    out = rotary_positional_embedding(x)
    out = jax.block_until_ready(out)

    ref = rope_reference(x)
    assert out.shape == (B, S, D)
    assert jnp.allclose(out, ref, atol=1e-5, rtol=1e-5), "mismatch vs reference"

    print("KERNEL_OK")
</pallas_src>

<mosaic_0001>
module attributes {stable_mosaic.version = 11 : i64} {
  func.func @_rope_kernel(%arg0: i32, %arg1: i32, %arg2: memref<1x8x32xf32, #tpu.memory_space<vmem>>, %arg3: memref<8x32xf32, #tpu.memory_space<vmem>>, %arg4: memref<8x32xf32, #tpu.memory_space<vmem>>, %arg5: memref<1x8x32xf32, #tpu.memory_space<vmem>>) attributes {dimension_semantics = [#tpu.dimension_semantics<parallel>, #tpu.dimension_semantics<parallel>], iteration_bounds = array<i64: 1, 2>, scalar_prefetch = 0 : i64, scratch_operands = 0 : i64, tpu.core_type = #tpu.core_type<tc>, window_params = [{transform_indices = @transform_0, window_bounds = array<i64: 1, 8, 32>}, {transform_indices = @transform_1, window_bounds = array<i64: 8, 32>}, {transform_indices = @transform_2, window_bounds = array<i64: 8, 32>}, {transform_indices = @transform_3, window_bounds = array<i64: 1, 8, 32>}]} {
    %c0 = arith.constant 0 : index
    %c0_0 = arith.constant 0 : index
    %c0_1 = arith.constant 0 : index
    %0 = vector.load %arg2[%c0, %c0_0, %c0_1] : memref<1x8x32xf32, #tpu.memory_space<vmem>>, vector<1x8x32xf32>
    %1 = vector.shape_cast %0 : vector<1x8x32xf32> to vector<8x32xf32>
    %2 = vector.extract_strided_slice %1 {offsets = [0, 16], sizes = [8, 16], strides = [1, 1]} : vector<8x32xf32> to vector<8x16xf32>
    %3 = vector.extract_strided_slice %1 {offsets = [0, 0], sizes = [8, 16], strides = [1, 1]} : vector<8x32xf32> to vector<8x16xf32>
    %4 = tpu.concatenate %2, %3 in 1 : vector<8x16xf32>, vector<8x16xf32> -> vector<8x32xf32>
    %c0_2 = arith.constant 0 : index
    %c0_3 = arith.constant 0 : index
    %5 = vector.load %arg3[%c0_2, %c0_3] : memref<8x32xf32, #tpu.memory_space<vmem>>, vector<8x32xf32>
    %6 = arith.mulf %1, %5 : vector<8x32xf32>
    %c0_4 = arith.constant 0 : index
    %c0_5 = arith.constant 0 : index
    %7 = vector.load %arg4[%c0_4, %c0_5] : memref<8x32xf32, #tpu.memory_space<vmem>>, vector<8x32xf32>
    %8 = arith.mulf %4, %7 : vector<8x32xf32>
    %9 = arith.addf %6, %8 : vector<8x32xf32>
    %c0_6 = arith.constant 0 : index
    %c0_7 = arith.constant 0 : index
    %c0_8 = arith.constant 0 : index
    %10 = vector.load %arg5[%c0_6, %c0_7, %c0_8] : memref<1x8x32xf32, #tpu.memory_space<vmem>>, vector<1x8x32xf32>
    %11 = vector.shape_cast %10 : vector<1x8x32xf32> to vector<8x32xf32>
    %12 = vector.shape_cast %9 : vector<8x32xf32> to vector<1x8x32xf32>
    tpu.vector_store %arg5[%c0_6, %c0_7, %c0_8], %12 {strides = array<i32>} : memref<1x8x32xf32, #tpu.memory_space<vmem>>, vector<1x8x32xf32>,
    return
  }
  func.func @transform_0(%arg0: i32, %arg1: i32) -> (i32, i32, i32) {
    %c0_i32 = arith.constant 0 : i32
    %c0_i32_0 = arith.constant 0 : i32
    return %arg1, %arg0, %c0_i32 : i32, i32, i32
  }
  func.func @transform_1(%arg0: i32, %arg1: i32) -> (i32, i32) {
    %c0_i32 = arith.constant 0 : i32
    %c0_i32_0 = arith.constant 0 : i32
    return %arg0, %c0_i32 : i32, i32
  }
  func.func @transform_2(%arg0: i32, %arg1: i32) -> (i32, i32) {
    %c0_i32 = arith.constant 0 : i32
    %c0_i32_0 = arith.constant 0 : i32
    return %arg0, %c0_i32 : i32, i32
  }
  func.func @transform_3(%arg0: i32, %arg1: i32) -> (i32, i32, i32) {
    %c0_i32 = arith.constant 0 : i32
    %c0_i32_0 = arith.constant 0 : i32
    return %arg1, %arg0, %c0_i32 : i32, i32, i32
  }
}

</mosaic_0001>

<bundles_post_ra>
// kernel: tpu_custom_call.1
= control target key start
LH: loop header
LB: loop body
LE: loop exit
PB: predicated region body
PF: predicated region fallthrough
CT: control target
= control target key end

     0   :  { %8 = vsyncpa [#allocation3], 0  ;;  %s922_s0 = inlined_call_operand.hbm [shape: f32[2,8,32], index: 0, kind: input, shape index: {}]   ;;  %s923_s1 = inlined_call_operand.hbm [shape: f32[8,32], index: 1, kind: input, shape index: {}]   ;;  %s924_s2 = inlined_call_operand.hbm [shape: f32[8,32], index: 2, kind: input, shape index: {}]   ;;  %s925_s3 = inlined_call_operand.hbm [shape: f32[2,8,32], index: 3, kind: output, shape index: {}]  }
   0x1   :  { %10 = vsyncpa [#allocation3 + $0x1], 0 }
   0x2   :  { %11 = vsyncpa [#allocation6], 0 }
   0x3   :  { %12 = vsyncpa [#allocation4], 0 }
   0x4   :  { %14 = vsyncpa [#allocation4 + $0x1], 0  ;;  %s679_s12 = smov 0   ;;  %s681_s13 = smov 0  }
   0x5   :  { %s683_s14 = smov 0   ;;  %s685_s15 = smov 0  }
   0x6   :  { %s687_s16 = smov 0   ;;  %s689_s17 = smov 0  }
   0x7 LB: > { %s377_s18 = sadd.s32 4294967295, %s651_s17   ;;  %s378_s19 = sadd.s32 4294967294, %s651_s17   ;;  %s651_s17 = sphi %s689_s17, %s20_s17   ;;  %s647_s16 = sphi %s687_s16, %s948_s16   ;;  %s643_s15 = sphi %s685_s15, %s947_s15   ;;  %s639_s14 = sphi %s683_s14, %s946_s14   ;;  %s635_s13 = sphi %s681_s13, %s945_s13   ;;  %s631_s12 = sphi %s679_s12, %s944_s12  }
   0x8   : > { %p54_p0 = scmp.ne.s32.totalorder %s635_s13, %s631_s12  ;;  %p713_p1 = scmp.eq.s32.totalorder %s377_s18, 0 }
   0x9   : > { %p717_p2 = scmp.eq.s32.totalorder %s377_s18, 1  ;;  %p138_p3 = scmp.eq.s32.totalorder %s378_s19, 1 }
   0xa   : > { %s930_s20 = scalar_select %p713_p1, 1, 0 }
   0xb   : > { %s931_s21 = scalar_select %p717_p2, 1, 0 }
   0xc   : > { %p723_p4 = por %p713_p1, %p54_p0  ;;  %p379_p5 = scmp.ge.s32.totalorder %s651_s17, 1 }
   0xd   : > { %p728_p6 = por %p138_p3, %p54_p0  ;;  %p145_p7 = scmp.lt.s32.totalorder %s651_s17, 3 }
   0xe   : > { %s932_s22 = scalar_select %p723_p4, 1, 0 }
   0xf   : > { %s933_s23 = scalar_select %p728_p6, 1, 0 }
  0x10   : > { %p733_p8 = pnand %p379_p5, %p145_p7  ;;  %s653_s25 = smov [#allocation5]  }
  0x11   : > { %s160_s26 = sshll.u32 %s653_s25, 4  ;;  %s654_s27 = smov [#allocation7]   ;;  %s161_s26 = int_to_ptr.vmem [resolvable:$true] %s160_s26 }
  0x12   : > { %s934_s24 = scalar_select %p733_p8, 1, 0 }
  0x13   : > { %p406_p10 = pneg %p733_p8  ;;  %s173_s28 = sshll.u32 %s654_s27, 4  ;;  %s746_s28 = int_to_ptr.vmem [resolvable:$true] %s173_s28 }
  0x14   : > { %s479_s5 = scalar_lea.hbm %s923_s1, 128 }
  0x15   : > { %p742_p11 = pnand %p406_p10, %p713_p1  ;;  %p480_p12 = scmp.ne.s32.totalorder %s923_s1, %s479_s5 }
  0x16   : > { %p486_p5 = scmp.lt.u32.totalorder %s479_s5, %s923_s1 }
  0x17   : > { %p481_p13 = pneg %p742_p11 }
  0x19   : > { %p482_p0 = pnand %p481_p13, %p480_p12 }
  0x1b   : > { %p483_p3 = pneg %p482_p0 }
  0x1d   : > { %p488_p7 = pnand %p486_p5, %p483_p3 }
  0x1f   : > { %491 = shalt.err (!%p488_p7)
}
  0x20   : > { %s492_s10 = scalar_lea.vmem %s161_s26, 128  ;;  %p500_p1 = scmp.lt.s32.totalorder %s161_s26, %s161_s26 }
  0x21   : > { %p493_p10 = scmp.ne.s32.totalorder %s161_s26, %s492_s10  ;;  %p501_p4 = scmp.lt.s32.totalorder %s492_s10, %s492_s10 }
  0x23   : > { %p495_p9 = pnand %p493_p10, %p481_p13  ;;  %p502_p8 = por %p501_p4, %p500_p1 }
  0x25   : > { %p496_p6 = pneg %p495_p9 }
  0x27   : > { %p503_p2 = pnand %p502_p8, %p496_p6 }
  0x29   : > { %506 = shalt.err (!%p503_p2)
}
  0x2a   : > { %409 = dma.hbm_to_vmem [thread:$0]  (!%p742_p11), %s923_s1, 128, %s161_s26, [#allocation6]  }
  0x2b   : > { %s507_s27 = scalar_lea.hbm %s924_s2, 128 }
  0x2c   : > { %p508_p9 = scmp.ne.s32.totalorder %s924_s2, %s507_s27  ;;  %p514_p2 = scmp.lt.u32.totalorder %s507_s27, %s924_s2 }
  0x2e   : > { %p510_p1 = pnand %p508_p9, %p481_p13 }
  0x30   : > { %p511_p4 = pneg %p510_p1 }
  0x32   : > { %p516_p6 = pnand %p514_p2, %p511_p4 }
  0x34   : > { %519 = shalt.err (!%p516_p6)
}
  0x35   : > { %s520_s26 = scalar_lea.vmem %s746_s28, 128  ;;  %p528_p3 = scmp.lt.s32.totalorder %s746_s28, %s746_s28 }
  0x36   : > { %p521_p8 = scmp.ne.s32.totalorder %s746_s28, %s520_s26  ;;  %p529_p5 = scmp.lt.s32.totalorder %s520_s26, %s520_s26 }
  0x38   : > { %p523_p12 = pnand %p521_p8, %p481_p13  ;;  %p530_p7 = por %p529_p5, %p528_p3 }
  0x3a   : > { %p524_p0 = pneg %p523_p12 }
  0x3c   : > { %p531_p10 = pnand %p530_p7, %p524_p0 }
  0x3e   : > { %534 = shalt.err (!%p531_p10)
}
  0x3f   : > { %412 = dma.hbm_to_vmem [thread:$0]  (!%p742_p11), %s924_s2, 128, %s746_s28, [#allocation6]  }
  0x40   : > { %s29_s9 = sadd.s32 1, %s647_s16  ;;  %s41_s10 = sadd.s32 1, %s639_s14 }
  0x41   : > { %p30_p13 = scmp.ge.s32.totalorder %s29_s9, 2  ;;  %p48_p9 = scmp.ne.s32.totalorder %s639_s14, %s635_s13 }
  0x42   : > { %p49_p1 = scmp.eq.s32.totalorder %s651_s17, 0  ;;  %p423_p4 = scmp.lt.s32.totalorder %s651_s17, 2 }
  0x43   : > { %s950_s9 = smov (%p30_p13, %s29_s9), 0  ;;  %p936_p6 = scmp.ne.s32.totalorder %s931_s21, 0 }
  0x44   : > { %p50_p2 = por %p49_p1, %p48_p9  ;;  %s36_s11 = ssub.s32 %s647_s16, %s950_s9 }
  0x45   : > { %p805_p8 = por %p936_p6, %p48_p9  ;;  %s184_s18 = sand.u32 1, %s639_s14  }
  0x46   : > { %p39_p12 = scmp.eq.s32.totalorder %s36_s11, 0  ;;  %s383_s28 = sshll.u32 %s184_s18, 3 }
  0x47   : > { %s384_s19 = sshll.u32 %s647_s16, 7  ;;  %s188_s21 = scalar_lea.vmem [#allocation2], %s383_s28 }
  0x48   : > { %s814_s25 = scalar_select %p39_p12, %s639_s14, %s41_s10  }
  0x49   : > { %s819_s4 = scalar_lea.hbm %s922_s0, %s384_s19  ;;  %s196_s5 = sshll.u32 %s188_s21, 4  ;;  %s827_s5 = int_to_ptr.vmem [resolvable:$true] %s196_s5 }
  0x4a   : > { %p823_p11 = pnand %p423_p4, %p50_p2  ;;  %s185_s26 = scalar_lea.sflag [#allocation3], %s184_s18 }
  0x4b   : > { %s535_s7 = scalar_lea.hbm %s819_s4, 128  ;;  %s540_s11 = scalar_lea.hbm %s922_s0, 256 }
  0x4c   : > { %p536_p0 = scmp.ne.s32.totalorder %s819_s4, %s535_s7  ;;  %p537_p3 = pneg %p823_p11 }
  0x4d   : > { %p541_p10 = scmp.lt.u32.totalorder %s819_s4, %s922_s0  ;;  %p542_p13 = scmp.lt.u32.totalorder %s540_s11, %s535_s7 }
  0x4e   : > { %p538_p5 = pnand %p537_p3, %p536_p0  ;;  %p544_p1 = scmp.lt.u32.totalorder %s535_s7, %s819_s4 }
  0x4f   : > { %p543_p9 = por %p542_p13, %p541_p10 }
  0x50   : > { %p539_p7 = pneg %p538_p5 }
  0x51   : > { %p545_p4 = por %p544_p1, %p543_p9 }
  0x53   : > { %p546_p2 = pnand %p545_p4, %p539_p7 }
  0x55   : > { %549 = shalt.err (!%p546_p2)
}
  0x56   : > { %s550_s18 = scalar_lea.vmem %s827_s5, 128  ;;  %s655_s27 = smov [#allocation2]  }
  0x57   : > { %p551_p6 = scmp.ne.s32.totalorder %s827_s5, %s550_s18  ;;  %s555_s30 = sshll.u32 %s655_s27, 4  ;;  %s556_s30 = int_to_ptr.vmem [resolvable:$false] %s555_s30 }
  0x58   : > { %s557_s21 = scalar_lea.vmem %s556_s30, 256  ;;  %p558_p5 = scmp.lt.s32.totalorder %s827_s5, %s556_s30 }
  0x59   : > { %p553_p12 = pnand %p551_p6, %p537_p3  ;;  %p559_p10 = scmp.lt.s32.totalorder %s557_s21, %s550_s18 }
  0x5b   : > { %p554_p0 = pneg %p553_p12  ;;  %p560_p13 = por %p559_p10, %p558_p5 }
  0x5d   : > { %p561_p9 = pnand %p560_p13, %p554_p0 }
  0x5f   : > { %564 = shalt.err (!%p561_p9)
}
  0x60   : > { %416 = dma.hbm_to_vmem [thread:$0]  (!%p823_p11), %s819_s4, 128, %s827_s5, %s185_s26  }
  0x61   : > { %p939_p7 = scmp.ne.s32.totalorder %s934_s24, 0 }
  0x62   : > { %s857_s7 = sand.u32 (!%p939_p7), 1, %s635_s13   ;;  %p940_p3 = scmp.ne.s32.totalorder (!%p939_p7), %s932_s22, 0 }
  0x63   : > { %205 = sbr.rel (%p939_p7) target bundleno = 249 (0xf9), region = 32  ;;  %s386_s8 = sshll.u32 (!%p939_p7), %s857_s7, 3 }
  0x64   : > { %s208_s10 = scalar_lea.sflag (!%p939_p7), [#allocation3], %s857_s7  ;;  %s211_s11 = scalar_lea.vmem (!%p939_p7), [#allocation2], %s386_s8 }
  0x6a   : > { %618 = dma.done.wait (%p940_p3), %s208_s10, 128  }
  0x6b   : > { %620 = vsyncadd (%p940_p3), %s208_s10, 4294967168  ;;  %p941_p1 = scmp.ne.s32.totalorder %s930_s20, 0 }
  0x6d   : > { %622 = dma.done.wait (%p941_p1), [#allocation6], 256  }
  0x6e   : > { %624 = vsyncadd (%p941_p1), [#allocation6], 4294967040  ;;  %v242_v0 = vld [vmem:[%s211_s11] sm:$0xff]  ;;  %s656_s24 = smov 112   ;;  %s657_s4 = smov 16   ;;  %v252_v2 = vld [vmem:[#allocation5] sm:$0xff] }
  0x6f   : > { %244 = vrot.lane.b32.xlu0 %v242_v0, %s656_s24  ;;  %vm250_vm0 = vcmask 130048   ;;  %v254_v3 = vld [vmem:[#allocation7] sm:$0xff]  ;;  %v253_v4 = vmul.f32 %v252_v2, %v242_v0  ;;  %s391_s22 = sshll.u32 %s643_s15, 7  ;;  %s241_s5 = scalar_lea.vmem [#allocation8], %s386_s8  ;;  %vm257_vm1 = vcmask 261120  }
  0x70   : > { %s274_s6 = sshll.u32 %s241_s5, 4  ;;  %s873_s28 = scalar_lea.hbm %s925_s3, %s391_s22  ;;  %s875_s6 = int_to_ptr.vmem [resolvable:$true] %s274_s6 }
  0x71   : > { %s260_s19 = scalar_lea.sflag [#allocation4], %s857_s7  ;;  %s565_s18 = scalar_lea.vmem %s875_s6, 128 }
  0x72   : > { %p566_p11 = scmp.ne.s32.totalorder %s875_s6, %s565_s18  ;;  %s658_s15 = smov [#allocation8]  }
  0x73   : > { %247 = vrot.lane.b32.xlu0 %v242_v0, %s657_s4  ;;  %s569_s27 = sshll.u32 %s658_s15, 4  ;;  %s570_s27 = int_to_ptr.vmem [resolvable:$false] %s569_s27 }
  0x74   : > { %p567_p4 = pnand %p566_p11, %p805_p8  ;;  %s571_s30 = scalar_lea.vmem %s570_s27, 256 }
  0x75   : > { %p572_p6 = scmp.lt.s32.totalorder %s875_s6, %s570_s27  ;;  %p573_p12 = scmp.lt.s32.totalorder %s571_s30, %s565_s18 }
  0x76   : > { %p568_p2 = pneg %p567_p4 }
  0x77   : > { %p574_p0 = por %p573_p12, %p572_p6 }
  0x79   : > { %p575_p5 = pnand %p574_p0, %p568_p2 }
  0xe1   : > { %v245_v1 = vpop.permute.xlu0 %244 }
  0xe5   : > { %v248_v5 = vpop.permute.xlu0 %247 }
  0xe6   : > { %v251_v6 = vsel %vm250_vm0, %v245_v1, %v248_v5 }
  0xe7   : > { %v255_v7 = vmul.f32 %v254_v3, %v251_v6 }
  0xe9   : > { %v256_v8 = vadd.f32 %v255_v7, %v253_v4 }
  0xeb   : > { %258 = vst.msk [vmem:[%s241_s5] sm:$0xff] %vm257_vm1, %v256_v8 }
  0xec   : > { %578 = shalt.err (!%p575_p5)
}
  0xed   : > { %s579_s21 = scalar_lea.hbm %s873_s28, 128  ;;  %s583_s10 = scalar_lea.hbm %s925_s3, 256 }
  0xee   : > { %p580_p10 = scmp.ne.s32.totalorder %s873_s28, %s579_s21  ;;  %p584_p7 = scmp.lt.u32.totalorder %s873_s28, %s925_s3 }
  0xef   : > { %p585_p3 = scmp.lt.u32.totalorder %s583_s10, %s579_s21  ;;  %p587_p11 = scmp.lt.u32.totalorder %s579_s21, %s873_s28 }
  0xf0   : > { %p581_p13 = pnand %p580_p10, %p805_p8 }
  0xf1   : > { %p586_p1 = por %p585_p3, %p584_p7 }
  0xf2   : > { %p582_p9 = pneg %p581_p13 }
  0xf3   : > { %p588_p4 = por %p587_p11, %p586_p1 }
  0xf5   : > { %p589_p2 = pnand %p588_p4, %p582_p9 }
  0xf7   : > { %592 = shalt.err (!%p589_p2)
}
  0xf8   : > { %404 = dma.vmem_to_hbm [thread:$0]  (%p805_p8), %s875_s6, 128, %s873_s28, %s260_s19  }
  0xf9 PF: > { %s286_s4 = sand.u32 1, %s631_s12   ;;  %p942_p6 = scmp.ne.s32.totalorder %s933_s23, 0 }
  0xfa   : > { %p943_p12 = scmp.ge.s32.totalorder %s651_s17, 2  ;;  %s287_s22 = scalar_lea.sflag [#allocation4], %s286_s4 }
  0xfc   : > { %p418_p0 = pnand %p943_p12, %p942_p6 }
  0xfe   : > { %626 = dma.done.wait (!%p418_p0), %s287_s22, 128  }
  0xff   : > { %628 = vsyncadd (!%p418_p0), %s287_s22, 4294967168  ;;  %s20_s17 = sadd.s32 1, %s651_s17   ;;  %s944_s12 = smov %s635_s13 }
 0x100   : > { %p17_p5 = scmp.ge.s32.totalorder %s20_s17, 4   ;;  %s945_s13 = smov %s639_s14 }
 0x101   : > { %s946_s14 = smov %s814_s25  ;;  %s947_s15 = smov %s647_s16 }
 0x102   : > { %s948_s16 = smov %s950_s9  ;;  %19 = sbr.rel (!%p17_p5) target bundleno = 7 (0x7), region = 87 }
 0x109   :  { %292 = vsyncpa [#allocation3], 1 }
 0x10a   :  { %294 = vsyncpa [#allocation3 + $0x1], 1 }
 0x10b   :  { %295 = vsyncpa [#allocation6], 1 }
 0x10c   :  { %296 = vsyncpa [#allocation4], 1 }
 0x10d   :  { %298 = vsyncpa [#allocation4 + $0x1], 1 }

</bundles_post_ra>
